<compile_context>
chip_gen: v5e
topology: v5e:2x2
jax: 0.10.0
libtpu: 0.0.40
codegen_flags: <defaults>
</compile_context>

<pallas_src>
import jax
import jax.numpy as jnp
from jax.experimental import pallas as pl
from jax.experimental.pallas import tpu as pltpu


def make_attention2d_kernel(temperature: float, hw: int):
    inv_temp = 1.0 / float(temperature)
    inv_hw = 1.0 / float(hw)

    def kernel(x_ref, w1_ref, w2_ref, b2_ref, o_ref, acc_ref):
        # x_ref  : (n_tile, C, s_tile)  native dtype -- NCHW, spatial flat on lanes
        # w1_ref : (C, hidden) f32      -- fc1 weight (1x1 conv, no bias), (in, out)
        # w2_ref : (hidden, K) f32      -- fc2 weight (1x1 conv), (in, out)
        # b2_ref : (1, K)      f32      -- fc2 bias
        # o_ref  : (n_tile, K) f32      -- softmax attention weights
        # acc_ref: (n_tile, C) f32      -- running spatial sum (scratch)
        s = pl.program_id(1)

        @pl.when(s == 0)
        def _init():
            acc_ref[...] = jnp.zeros_like(acc_ref)

        # Spatial (lane-axis) partial sum, accumulated in f32 (XLU reduce; mem-bound).
        acc_ref[...] += jnp.sum(x_ref[...].astype(jnp.float32), axis=-1)

        @pl.when(s == pl.num_programs(1) - 1)
        def _finalize():
            pooled = acc_ref[...] * inv_hw                               # AdaptiveAvgPool2d(1)
            h = jnp.dot(pooled, w1_ref[...],
                        preferred_element_type=jnp.float32)              # fc1 (tiny; latency only)
            h = jnp.maximum(h, 0.0)                                      # ReLU
            logits = jnp.dot(h, w2_ref[...],
                             preferred_element_type=jnp.float32) + b2_ref[...]  # fc2 (+bias)
            z = logits * inv_temp
            z = z - jnp.max(z, axis=-1, keepdims=True)                   # stable softmax
            e = jnp.exp(z)
            denom = jnp.sum(e, axis=-1, keepdims=True)
            o_ref[...] = (e * pl.reciprocal(denom)).astype(o_ref.dtype)  # exact recip

    return kernel


def _choose_batch_tile(n: int, max_rows: int = 64) -> int:
    # Sublane-friendly batch tile: a multiple of 8 that divides N, else the full
    # N extent (a full-extent block dim is exempt from the (8,128) rule).
    if n % 8 == 0:
        t = 8
        while t * 2 <= min(n, max_rows) and n % (t * 2) == 0:
            t *= 2
        return t
    return n


def _choose_spatial_tile(hw: int, rows: int, itemsize: int,
                         max_tile_bytes: int = 4 << 20) -> int:
    # Largest multiple-of-128 divisor of H*W whose (rows, tile) block stays
    # under the per-buffer byte budget (double-buffering doubles the footprint).
    if hw % 128 != 0:
        return hw  # full-extent block (exempt from the lane-divisibility rule)
    budget_lanes = max(128, (max_tile_bytes // max(1, rows * itemsize)) // 128 * 128)
    tile, cand = 128, 128
    limit = min(hw, budget_lanes)
    while cand <= limit:
        if hw % cand == 0:
            tile = cand
        cand += 128
    return tile


def attention2d_forward(x_nchw, w1_pt, w2_pt, b2, temperature):
    N, C, H, W = x_nchw.shape
    hidden = w1_pt.shape[0]
    K = w2_pt.shape[0]
    HW = H * W

    # Free reshape: keep NCHW layout, flatten spatial onto the lane axis. No
    # transpose and no dtype upcast in the wrapper (x travels in native dtype).
    x = x_nchw.reshape(N, C, HW)
    # 1x1-conv weights (out, in, 1, 1) -> (in, out) so the kernel does plain matmuls.
    w1 = jnp.transpose(w1_pt.reshape(hidden, C)).astype(jnp.float32)   # (C, hidden)
    w2 = jnp.transpose(w2_pt.reshape(K, hidden)).astype(jnp.float32)   # (hidden, K)
    b2r = b2.reshape(1, K).astype(jnp.float32)

    n_tile = _choose_batch_tile(N)
    s_tile = _choose_spatial_tile(HW, n_tile * C, x.dtype.itemsize)
    n_chunks = HW // s_tile

    out = pl.pallas_call(
        make_attention2d_kernel(temperature, HW),
        out_shape=jax.ShapeDtypeStruct((N, K), jnp.float32),
        grid_spec=pltpu.PrefetchScalarGridSpec(
            num_scalar_prefetch=0,
            grid=(N // n_tile, n_chunks),
            in_specs=[
                pl.BlockSpec((n_tile, C, s_tile), lambda i, s: (i, 0, s)),
                pl.BlockSpec((C, hidden), lambda i, s: (0, 0)),
                pl.BlockSpec((hidden, K), lambda i, s: (0, 0)),
                pl.BlockSpec((1, K), lambda i, s: (0, 0)),
            ],
            out_specs=pl.BlockSpec((n_tile, K), lambda i, s: (i, 0)),
            scratch_shapes=[pltpu.VMEM((n_tile, C), jnp.float32)],
        ),
        compiler_params=pltpu.CompilerParams(
            dimension_semantics=("parallel", "arbitrary"),
        ),
    )(x, w1, w2, b2r)
    return out


if __name__ == "__main__":
    key = jax.random.PRNGKey(0)

    # Module hyper-params (consistent with attention2d.__init__):
    N, C, H, W = 2, 4, 16, 16
    ratios = 0.25
    K = 4
    temperature = 4                        # satisfies temperature % 3 == 1
    hidden = int(C * ratios) + 1           # in_planes != 3 branch -> hidden = 2

    kx, k1, k2 = jax.random.split(key, 3)
    x = jax.random.normal(kx, (N, C, H, W), dtype=jnp.float32)

    # Deterministic kaiming_normal(mode='fan_out', nonlinearity='relu') init:
    # std = sqrt(2 / fan_out); conv bias initialized to 0.
    std1 = (2.0 / hidden) ** 0.5           # fc1 weight: (hidden, C, 1, 1), fan_out = hidden
    std2 = (2.0 / K) ** 0.5                # fc2 weight: (K, hidden, 1, 1), fan_out = K
    w1_pt = std1 * jax.random.normal(k1, (hidden, C, 1, 1), dtype=jnp.float32)
    w2_pt = std2 * jax.random.normal(k2, (K, hidden, 1, 1), dtype=jnp.float32)
    b2 = jnp.zeros((K,), dtype=jnp.float32)

    out = attention2d_forward(x, w1_pt, w2_pt, b2, temperature)
    out = jax.block_until_ready(out)
    assert out.shape == (N, K)

    # Pure-JAX reference (mirrors the PyTorch forward exactly).
    pooled = jnp.mean(x, axis=(2, 3))                               # (N, C)
    h_ref = jnp.maximum(pooled @ w1_pt.reshape(hidden, C).T, 0.0)   # fc1 + relu
    logits_ref = h_ref @ w2_pt.reshape(K, hidden).T + b2            # fc2
    ref = jax.nn.softmax(logits_ref / temperature, axis=1)
    assert jnp.allclose(out, ref, atol=1e-5), (out, ref)

    print("KERNEL_OK")
</pallas_src>

<mosaic_0001>
module attributes {stable_mosaic.version = 11 : i64} {
  func.func @kernel(%arg0: i32, %arg1: i32, %arg2: memref<2x4x256xf32, #tpu.memory_space<vmem>>, %arg3: memref<4x2xf32, #tpu.memory_space<vmem>>, %arg4: memref<2x4xf32, #tpu.memory_space<vmem>>, %arg5: memref<1x4xf32, #tpu.memory_space<vmem>>, %arg6: memref<2x4xf32, #tpu.memory_space<vmem>>, %arg7: memref<2x4xf32, #tpu.memory_space<vmem>>) attributes {dimension_semantics = [#tpu.dimension_semantics<parallel>, #tpu.dimension_semantics<arbitrary>], iteration_bounds = array<i64: 1, 1>, scalar_prefetch = 0 : i64, scratch_operands = 1 : i64, tpu.core_type = #tpu.core_type<tc>, window_params = [{transform_indices = @transform_0, window_bounds = array<i64: 2, 4, 256>}, {pipeline_mode = #tpu.pipeline_mode<synchronous>, transform_indices = @transform_1, window_bounds = array<i64: 4, 2>}, {pipeline_mode = #tpu.pipeline_mode<synchronous>, transform_indices = @transform_2, window_bounds = array<i64: 2, 4>}, {pipeline_mode = #tpu.pipeline_mode<synchronous>, transform_indices = @transform_3, window_bounds = array<i64: 1, 4>}, {transform_indices = @transform_4, window_bounds = array<i64: 2, 4>}]} {
    %c0_i32 = arith.constant 0 : i32
    %0 = arith.cmpi eq, %arg1, %c0_i32 : i32
    %1 = arith.extui %0 : i1 to i32
    %c0_i32_0 = arith.constant 0 : i32
    %2 = arith.cmpi ne, %1, %c0_i32_0 : i32
    scf.if %2 {
      %cst_9 = arith.constant 0.000000e+00 : f32
      %11 = vector.broadcast %cst_9 : f32 to vector<2x4xf32>
      %c0_10 = arith.constant 0 : index
      %c0_11 = arith.constant 0 : index
      %12 = vector.load %arg7[%c0_10, %c0_11] : memref<2x4xf32, #tpu.memory_space<vmem>>, vector<2x4xf32>
      tpu.vector_store %arg7[%c0_10, %c0_11], %11 {strides = array<i32>} : memref<2x4xf32, #tpu.memory_space<vmem>>, vector<2x4xf32>,
    } else {
    }
    %c0 = arith.constant 0 : index
    %c0_1 = arith.constant 0 : index
    %3 = vector.load %arg7[%c0, %c0_1] : memref<2x4xf32, #tpu.memory_space<vmem>>, vector<2x4xf32>
    %c0_2 = arith.constant 0 : index
    %c0_3 = arith.constant 0 : index
    %c0_4 = arith.constant 0 : index
    %4 = vector.load %arg2[%c0_2, %c0_3, %c0_4] : memref<2x4x256xf32, #tpu.memory_space<vmem>>, vector<2x4x256xf32>
    %cst = arith.constant dense<0.000000e+00> : vector<2x4xf32>
    %5 = vector.multi_reduction <add>, %4, %cst [2] : vector<2x4x256xf32> to vector<2x4xf32>
    %6 = arith.addf %3, %5 : vector<2x4xf32>
    %c0_5 = arith.constant 0 : index
    %c0_6 = arith.constant 0 : index
    %7 = vector.load %arg7[%c0_5, %c0_6] : memref<2x4xf32, #tpu.memory_space<vmem>>, vector<2x4xf32>
    tpu.vector_store %arg7[%c0_5, %c0_6], %6 {strides = array<i32>} : memref<2x4xf32, #tpu.memory_space<vmem>>, vector<2x4xf32>,
    %c0_i32_7 = arith.constant 0 : i32
    %8 = arith.cmpi eq, %arg1, %c0_i32_7 : i32
    %9 = arith.extui %8 : i1 to i32
    %c0_i32_8 = arith.constant 0 : i32
    %10 = arith.cmpi ne, %9, %c0_i32_8 : i32
    scf.if %10 {
      %c0_9 = arith.constant 0 : index
      %c0_10 = arith.constant 0 : index
      %11 = vector.load %arg7[%c0_9, %c0_10] : memref<2x4xf32, #tpu.memory_space<vmem>>, vector<2x4xf32>
      %cst_11 = arith.constant 3.906250e-03 : f32
      %12 = vector.broadcast %cst_11 : f32 to vector<2x4xf32>
      %13 = arith.mulf %11, %12 : vector<2x4xf32>
      %c0_12 = arith.constant 0 : index
      %c0_13 = arith.constant 0 : index
      %14 = vector.load %arg3[%c0_12, %c0_13] : memref<4x2xf32, #tpu.memory_space<vmem>>, vector<4x2xf32>
      %cst_14 = arith.constant dense<0.000000e+00> : vector<2x2xf32>
      %15 = tpu.matmul %13, %14, %cst_14 {dimension_numbers = #tpu.dot_dimension_numbers<[1], [0], [0], [1], [0, 0, 1, 1], [], []>} : vector<2x4xf32>, vector<4x2xf32>, vector<2x2xf32> -> vector<2x2xf32>
      %cst_15 = arith.constant 0.000000e+00 : f32
      %16 = vector.broadcast %cst_15 : f32 to vector<2x2xf32>
      %17 = arith.maximumf %15, %16 : vector<2x2xf32>
      %c0_16 = arith.constant 0 : index
      %c0_17 = arith.constant 0 : index
      %18 = vector.load %arg4[%c0_16, %c0_17] : memref<2x4xf32, #tpu.memory_space<vmem>>, vector<2x4xf32>
      %cst_18 = arith.constant dense<0.000000e+00> : vector<2x4xf32>
      %19 = tpu.matmul %17, %18, %cst_18 {dimension_numbers = #tpu.dot_dimension_numbers<[1], [0], [0], [1], [0, 0, 1, 1], [], []>} : vector<2x2xf32>, vector<2x4xf32>, vector<2x4xf32> -> vector<2x4xf32>
      %c0_19 = arith.constant 0 : index
      %c0_20 = arith.constant 0 : index
      %20 = vector.load %arg5[%c0_19, %c0_20] : memref<1x4xf32, #tpu.memory_space<vmem>>, vector<1x4xf32>
      %21 = vector.broadcast %20 : vector<1x4xf32> to vector<2x4xf32>
      %22 = arith.addf %19, %21 : vector<2x4xf32>
      %cst_21 = arith.constant 2.500000e-01 : f32
      %23 = vector.broadcast %cst_21 : f32 to vector<2x4xf32>
      %24 = arith.mulf %22, %23 : vector<2x4xf32>
      %cst_22 = arith.constant dense<0xFF800000> : vector<2xf32>
      %25 = vector.multi_reduction <maximumf>, %24, %cst_22 [1] : vector<2x4xf32> to vector<2xf32>
      %26 = vector.shape_cast %25 : vector<2xf32> to vector<2x1xf32>
      %27 = vector.broadcast %26 : vector<2x1xf32> to vector<2x4xf32>
      %28 = arith.subf %24, %27 : vector<2x4xf32>
      %29 = math.exp %28 : vector<2x4xf32>
      %cst_23 = arith.constant dense<0.000000e+00> : vector<2xf32>
      %30 = vector.multi_reduction <add>, %29, %cst_23 [1] : vector<2x4xf32> to vector<2xf32>
      %31 = vector.shape_cast %30 : vector<2xf32> to vector<2x1xf32>
      %32 = tpu.reciprocal %31 : vector<2x1xf32> -> vector<2x1xf32>
      %33 = vector.broadcast %32 : vector<2x1xf32> to vector<2x4xf32>
      %34 = arith.mulf %29, %33 : vector<2x4xf32>
      %c0_24 = arith.constant 0 : index
      %c0_25 = arith.constant 0 : index
      %35 = vector.load %arg6[%c0_24, %c0_25] : memref<2x4xf32, #tpu.memory_space<vmem>>, vector<2x4xf32>
      tpu.vector_store %arg6[%c0_24, %c0_25], %34 {strides = array<i32>} : memref<2x4xf32, #tpu.memory_space<vmem>>, vector<2x4xf32>,
    } else {
    }
    return
  }
  func.func @transform_0(%arg0: i32, %arg1: i32) -> (i32, i32, i32) {
    %c0_i32 = arith.constant 0 : i32
    %c0_i32_0 = arith.constant 0 : i32
    return %arg0, %c0_i32, %arg1 : i32, i32, i32
  }
  func.func @transform_1(%arg0: i32, %arg1: i32) -> (i32, i32) {
    %c0_i32 = arith.constant 0 : i32
    %c0_i32_0 = arith.constant 0 : i32
    %c0_i32_1 = arith.constant 0 : i32
    return %c0_i32, %c0_i32_0 : i32, i32
  }
  func.func @transform_2(%arg0: i32, %arg1: i32) -> (i32, i32) {
    %c0_i32 = arith.constant 0 : i32
    %c0_i32_0 = arith.constant 0 : i32
    %c0_i32_1 = arith.constant 0 : i32
    return %c0_i32, %c0_i32_0 : i32, i32
  }
  func.func @transform_3(%arg0: i32, %arg1: i32) -> (i32, i32) {
    %c0_i32 = arith.constant 0 : i32
    %c0_i32_0 = arith.constant 0 : i32
    %c0_i32_1 = arith.constant 0 : i32
    return %c0_i32, %c0_i32_0 : i32, i32
  }
  func.func @transform_4(%arg0: i32, %arg1: i32) -> (i32, i32) {
    %c0_i32 = arith.constant 0 : i32
    %c0_i32_0 = arith.constant 0 : i32
    return %arg0, %c0_i32 : i32, i32
  }
}

</mosaic_0001>

<bundles_post_ra>
// kernel: tpu_custom_call.1
= control target key start
LH: loop header
LB: loop body
LE: loop exit
PB: predicated region body
PF: predicated region fallthrough
CT: control target
= control target key end

     0   :  { %9 = vsyncpa [#allocation4], 0  ;;  %s310_s0 = inlined_call_operand.hbm [shape: f32[2,4,256], index: 0, kind: input, shape index: {}]   ;;  %s311_s1 = inlined_call_operand.vmem [shape: f32[4,2], index: 1, kind: input, shape index: {}]   ;;  %s312_s2 = inlined_call_operand.vmem [shape: f32[2,4], index: 2, kind: input, shape index: {}]   ;;  %s313_s3 = inlined_call_operand.vmem [shape: f32[1,4], index: 3, kind: input, shape index: {}]   ;;  %s314_s4 = inlined_call_operand.hbm [shape: f32[2,4], index: 4, kind: output, shape index: {}]  }
   0x1   :  { %10 = vsyncpa [#allocation5], 0  ;;  %s15_s17 = sshll.u32 %s310_s0, 4  ;;  %s255_s18 = smov [#allocation3]   ;;  %s16_s17 = int_to_ptr.hbm [resolvable:$true] %s15_s17 }
   0x2   :  { %s17_s19 = sshll.u32 %s255_s18, 4  ;;  %s256_s20 = smov 128   ;;  %s18_s19 = int_to_ptr.vmem [resolvable:$true] %s17_s19 }
   0x3   :  { %s257_s21 = smov 8  }
   0x4   :  { %23 = dma.hbm_to_vmem [thread:$0]  %s16_s17, 256, %s18_s19, [#allocation4], %s256_s20, %s256_s20, %s257_s21  }
   0x5   :  { %251 = dma.done.wait [#allocation4], 256  }
   0x6   :  { %252 = vsyncadd [#allocation4], 4294967040  ;;  %v41_v0 = vld [vmem:[#allocation3] sm:$0xff]  ;;  %v42_v1 = vld [vmem:[#allocation3 + $0x8] sm:$0xff]  ;;  %vm56_vm0 = vcmask 1043456   ;;  %vm38_vm1 = vcmask 25600   ;;  %v69_v15 = vlaneseq }
   0x7   :  { %45 = vst [vmem:[#allocation1] ss:$2 sm:$0xff] %v41_v0  ;;  %v258_v12 = vmov 0.0   ;;  %v84_v13 = vld [vmem:[%s311_s1] sm:$0xf]  ;;  %vm73_vm2 = vcmask 1041409  }
   0x8   :  { %49 = vst [vmem:[#allocation1 + $0x10] ss:$2 sm:$0xff] %v42_v1  ;;  %189 = vmatpush.msk.msra.mxu0 %vm56_vm0, %v84_v13  ;;  %v70_v16 = vand.u32 127, %v69_v15  ;;  %vm85_vm3 = vcmask 31744   ;;  %v113_v25 = vld [vmem:[%s312_s2] sm:$0x3] }
   0x9   :  { %39 = vst.msk [vmem:[#allocation2] sm:$0x3] %vm38_vm1, %v258_v12  ;;  %vm122_vm4 = vcmask 1041408   ;;  %vm118_vm5 = vcmask 15360   ;;  %v198_v28 = vld [vmem:[%s313_s3] ss:$0 sm:$0xff] }
   0xa   :  { %191 = vmatpush.msk.msra.mxu1 %vm122_vm4, %v113_v25  ;;  %s259_s2 = smov [#allocation6]   ;;  %s179_s28 = sshll.u32 %s314_s4, 4  ;;  %s180_s28 = int_to_ptr.hbm [resolvable:$true] %s179_s28 }
   0xb   :  { %s177_s3 = sshll.u32 %s259_s2, 4  ;;  %s178_s3 = int_to_ptr.vmem [resolvable:$true] %s177_s3 }
   0xe   :  { %v46_v2 = vld.sshfl [vmem:[#allocation1] sm:$0xff pattern:$0x75316420]  ;;  %v47_v3 = vld.sshfl [vmem:[#allocation1 + $0x8] sm:$0xff pattern:$0x75316420] }
   0xf   :  { %v57_v4 = vsel %vm56_vm0, %v46_v2, 0.0  ;;  %v58_v5 = vsel %vm56_vm0, %v47_v3, 0.0  ;;  %v50_v7 = vld.sshfl [vmem:[#allocation1 + $0x10] sm:$0xff pattern:$0x75316420] }
  0x10   :  { %v59_v6 = vadd.f32 %v58_v5, %v57_v4  ;;  %v51_v8 = vld.sshfl [vmem:[#allocation1 + $0x18] sm:$0xff pattern:$0x75316420]  ;;  %v62_v9 = vsel %vm56_vm0, %v50_v7, 0.0  ;;  %v40_v19 = vld [vmem:[#allocation2] sm:$0x3] }
  0x11   :  { %v63_v10 = vsel %vm56_vm0, %v51_v8, 0.0 }
  0x12   :  { %60 = vadd.xlane.f32.xlu0 %v59_v6  ;;  %v64_v11 = vadd.f32 %v63_v10, %v62_v9 }
  0x1a   :  { %65 = vadd.xlane.f32.xlu0 %v64_v11 }
  0x85   :  { %v61_v14 = vpop.xlane.xlu0 %60 }
  0x86   :  { %v71_v18 = vperm.slane %v61_v14, %v70_v16 }
  0x8d   :  { %v66_v17 = vpop.xlane.xlu0 %65 }
  0x8e   :  { %v72_v20 = vperm.slane %v66_v17, %v70_v16 }
  0x90   :  { %v74_v21 = vsel %vm73_vm2, %v72_v20, %v71_v18 }
  0x91   :  { %v76_v22 = vadd.f32 %v74_v21, %v40_v19 }
  0x93   :  { %78 = vst.msk [vmem:[#allocation2] sm:$0x3] %vm38_vm1, %v76_v22 }
  0x9a   :  { %v82_v23 = vld [vmem:[#allocation2] sm:$0x3] }
  0x9b   :  { %v83_v24 = vmul.f32 0.00390625, %v82_v23 }
  0x9d   :  { %190 = vmatmul.msk.f32.vlgmr.msra.gmra.mxu0 %vm85_vm3, %v83_v24 }
 0x11a   :  { %v109_v26 = vpop.f32.mrf.mxu0 }
 0x11b   :  { %v112_v27 = vmax.f32 %v109_v26, 0.0 }
 0x11d   :  { %192 = vmatmul.msk.f32.vlgmr.msra.gmra.mxu1 %vm118_vm5, %v112_v27 }
 0x19a   :  { %v143_v29 = vpop.f32.mrf.mxu1 }
 0x19b   :  { %v144_v30 = vadd.f32 %v198_v28, %v143_v29 }
 0x19d   :  { %v146_v31 = vmul.f32 0.25, %v144_v30 }
 0x19f   :  { %v147_v32 = vsel %vm38_vm1, %v146_v31, -inf }
 0x1a0   :  { %148 = vmax.xlane.f32.xlu1 %v147_v32 }
 0x213   :  { %v149_v33 = vpop.xlane.xlu1 %148 }
 0x214   :  { %v150_v34 = vsub.f32 %v146_v31, %v149_v33 }
 0x216   :  { %v151_v35 = vmul.f32 1.442695, %v150_v34 }
 0x218   :  { %199 = vpow2.f32 %v151_v35 }
 0x21e   :  { %v200_v36 = vpop.eup %199 }
 0x21f   :  { %v153_v37 = vsel %vm38_vm1, %v200_v36, 0.0 }
 0x220   :  { %154 = vadd.xlane.f32.xlu1 %v153_v37 }
 0x293   :  { %v155_v38 = vpop.xlane.xlu1 %154 }
 0x294   :  { %201 = vrcp.f32 %v155_v38  ;;  %v167_v42 = vand.u32 2147483648, %v155_v38  ;;  %v165_v44 = vand.u32 2147483647, %v155_v38  ;;  %vm161_vm7 = vweird.f32 %v155_v38 }
 0x296   :  { %v168_v46 = vor.u32 1.1754944e-38, %v167_v42  ;;  %vm166_vm9 = vcmp.eq.f32.partialorder %v165_v44, 8.507059e+37 }
 0x29a   :  { %v202_v39 = vpop.eup %201 }
 0x29b   :  { %v157_v40 = vmul.f32 %v202_v39, %v155_v38  ;;  %vm162_vm6 = vweird.f32 %v202_v39 }
 0x29c   :  { %vm163_vm8 = vmor %vm161_vm7, %vm162_vm6 }
 0x29d   :  { %v158_v41 = vsub.f32 1.0, %v157_v40 }
 0x29f   :  { %v159_v43 = vmul.f32 %v202_v39, %v158_v41 }
 0x2a1   :  { %v160_v45 = vadd.f32 %v202_v39, %v159_v43 }
 0x2a3   :  { %v164_v47 = vsel %vm163_vm8, %v202_v39, %v160_v45 }
 0x2a4   :  { %v169_v48 = vsel %vm166_vm9, %v168_v46, %v164_v47 }
 0x2a5   :  { %v170_v49 = vmul.f32 %v200_v36, %v169_v48 }
 0x2a7   :  { %171 = vst.msk [vmem:[#allocation6] sm:$0x3] %vm38_vm1, %v170_v49 }
 0x2a8   :  { %182 = dma.vmem_to_hbm [thread:$0]  %s178_s3, 32, %s180_s28, [#allocation5]  }
 0x2a9   :  { %253 = dma.done.wait [#allocation5], 32  }
 0x2aa   :  { %254 = vsyncadd [#allocation5], 4294967264 }
 0x2ab   :  { %187 = vsyncpa [#allocation4], 1 }
 0x2ac   :  { %188 = vsyncpa [#allocation5], 1 }

</bundles_post_ra>
